<compile_context>
chip_gen: v6e
topology: v6e:2x2x1
jax: 0.10.0
libtpu: 0.0.40
codegen_flags: <defaults>
</compile_context>

<pallas_src>
import jax
import jax.numpy as jnp
from jax import lax
from jax.experimental import pallas as pl
from jax.experimental.pallas import tpu as pltpu


def _round_up(x, m):
    return (x + m - 1) // m * m


def _vmem_capacity_bytes():
    """Physical per-core VMEM (128 MiB on v5e/v6e, 64 MiB per TC on v7x)."""
    try:
        cap = getattr(pltpu.get_tpu_info(), "vmem_capacity_bytes", None)
        if cap:
            return int(cap)
    except Exception:
        pass
    return 64 * 2**20        # conservative default (v7x per-TensorCore)


# ---------------------------------------------------------------------------
# Kernel A: channel mean / max pooling over a lane-dense (N, C, H*W) stream.
# ---------------------------------------------------------------------------
def _make_pool_kernel(C, c_tile, HW, needs_mask):
    inv_c = 1.0 / float(C)

    def kernel(x_ref, avg_ref, max_ref):
        # x_ref:   (1, c_tile, HW) input dtype (streamed, double-buffered)
        # avg_ref: (1, 1, HW) f32  resident output block (running channel sum)
        # max_ref: (1, 1, HW) f32  resident output block (running channel max)
        ci = pl.program_id(1)

        @pl.when(ci == 0)
        def _init():
            avg_ref[...] = jnp.zeros((1, 1, HW), jnp.float32)
            max_ref[...] = jnp.full((1, 1, HW), -jnp.inf, jnp.float32)

        xt = x_ref[...]                           # keep streamed tile in input dtype
        if needs_mask:
            # cdiv grid: channels past C in the last tile are undefined -> mask.
            ch = lax.broadcasted_iota(jnp.int32, (1, c_tile, HW), 1)
            valid = ch < (C - ci * c_tile)
            xs = jnp.where(valid, xt, jnp.zeros((), xt.dtype))
            xm = jnp.where(valid, xt, jnp.full((), -jnp.inf, xt.dtype))
        else:
            xs = xm = xt

        # Two sublane reductions over the same resident tile.  At HBM line rate
        # (~0.35-0.7 vregs/cycle arriving) this needs <1.5 vld + ~2 VALU ops per
        # data vreg, well under every generation's slot budget, so the fused
        # single-pass variant would not move the (bandwidth) roofline.
        avg_ref[...] += jnp.sum(xs, axis=1, keepdims=True, dtype=jnp.float32)
        max_ref[...] = jnp.maximum(
            max_ref[...], jnp.max(xm, axis=1, keepdims=True).astype(jnp.float32))

        @pl.when(ci == pl.num_programs(1) - 1)
        def _finalize():
            avg_ref[...] *= inv_c                 # running sum -> channel mean

    return kernel


# ---------------------------------------------------------------------------
# Kernel B: zero-padded 7x7 stencil over the 2-channel pooled maps + sigmoid.
# ---------------------------------------------------------------------------
def _make_conv_kernel(H, W, K, P):
    Hp, Wp = H + 2 * P, W + 2 * P

    def kernel(w_ref, avg_ref, max_ref, o_ref, pad_a, pad_m):
        # w_ref:  (2*K*K,) f32 scalars in SMEM (scalar-prefetched once)
        # avg_ref/max_ref: (1, 1, H, W) f32;  o_ref: (1, 1, H, W) out dtype
        # pad_a/pad_m: (Hp, Wp) f32 scratch (zero padding = PyTorch conv2d padding)
        pad_a[...] = jnp.zeros((Hp, Wp), jnp.float32)
        pad_m[...] = jnp.zeros((Hp, Wp), jnp.float32)
        pad_a[P:P + H, P:P + W] = avg_ref[0, 0]
        pad_m[P:P + H, P:P + W] = max_ref[0, 0]

        # 2-in / 1-out 7x7 stencil: 98 scalar-times-tile MACs, statically unrolled.
        acc = jnp.zeros((H, W), jnp.float32)
        for in_ch, src in enumerate((pad_a, pad_m)):       # ch 0 = avg, ch 1 = max
            base = in_ch * K * K
            for dy in range(K):
                for dx in range(K):
                    acc = acc + w_ref[base + dy * K + dx] * src[dy:dy + H, dx:dx + W]

        o_ref[...] = jax.nn.sigmoid(acc).astype(o_ref.dtype).reshape(1, 1, H, W)

    return kernel


def spatial_attention(x, conv_weight, *, kernel_size=7, c_tile=None):
    """x: (N, C, H, W); conv_weight: (1, 2, K, K) (PyTorch OIHW, bias=False).

    Returns sigmoid(conv2d(cat([mean_C(x), max_C(x)], 1))) of shape (N, 1, H, W).
    """
    N, C, H, W = x.shape
    K = kernel_size
    P = K // 2
    assert conv_weight.shape == (1, 2, K, K), conv_weight.shape
    HW = H * W
    w_flat = conv_weight.reshape(-1).astype(jnp.float32)       # (2*K*K,) -> SMEM
    x_flat = x.reshape(N, C, HW)                                # lane-dense stream

    # ---- channel tile from the per-core VMEM budget --------------------------
    itemsize = x.dtype.itemsize
    hw_lanes = _round_up(HW, 128)                 # lane padding of the minor dim
    per_ch = hw_lanes * itemsize                  # VMEM bytes per channel row
    out_vmem = 2 * 2 * 8 * hw_lanes * 4           # 2 outputs x 2 bufs, 8-sublane pad
    cap = _vmem_capacity_bytes()
    # Budget = largest tile s.t. 4x tile (double buffer + reduction/mask temps)
    # plus output buffers plus margin fits physical VMEM.
    budget = max(cap - out_vmem - 8 * 2**20, 4 * 8 * per_ch) // 4
    if c_tile is None:
        if _round_up(C, 8) * per_ch <= budget:
            c_tile = C                             # whole reduction in one step
        else:
            c_tile = max(8, (budget // per_ch) // 8 * 8)
            # TODO(synk): for feature maps so large that even 8 channels blow the
            # budget, additionally tile H with a 3-row halo.
    assert c_tile == C or (c_tile % 8 == 0 and 0 < c_tile <= C), (C, c_tile)
    num_ct = (C + c_tile - 1) // c_tile
    needs_mask = (C % c_tile) != 0

    x_tile_vmem = _round_up(c_tile, 8) * per_ch
    vmem_limit = int(min(cap - 2 * 2**20,
                         max(32 * 2**20, 4 * x_tile_vmem + out_vmem + 16 * 2**20)))

    # ---- kernel A: streamed channel mean / max --------------------------------
    avg_flat, max_flat = pl.pallas_call(
        _make_pool_kernel(C, c_tile, HW, needs_mask),
        out_shape=(jax.ShapeDtypeStruct((N, 1, HW), jnp.float32),
                   jax.ShapeDtypeStruct((N, 1, HW), jnp.float32)),
        grid_spec=pltpu.PrefetchScalarGridSpec(
            num_scalar_prefetch=0,
            grid=(N, num_ct),                       # reduction (channel) axis last
            in_specs=[pl.BlockSpec((1, c_tile, HW), lambda n, c: (n, c, 0))],
            out_specs=[pl.BlockSpec((1, 1, HW), lambda n, c: (n, 0, 0)),
                       pl.BlockSpec((1, 1, HW), lambda n, c: (n, 0, 0))],
        ),
        compiler_params=pltpu.CompilerParams(
            dimension_semantics=("parallel", "arbitrary"),
            vmem_limit_bytes=vmem_limit,
        ),
    )(x_flat)
    # TODO(synk): on v7x with N == 1 only one TensorCore is busy; split the channel
    # reduction across cores (per-core partial sum/max + combine) to fill both.

    avg_2d = avg_flat.reshape(N, 1, H, W)           # free metadata reshapes in HBM
    max_2d = max_flat.reshape(N, 1, H, W)

    # ---- kernel B: tiny per-image 7x7 conv + sigmoid ---------------------------
    Hp, Wp = H + 2 * P, W + 2 * P
    out = pl.pallas_call(
        _make_conv_kernel(H, W, K, P),
        out_shape=jax.ShapeDtypeStruct((N, 1, H, W), x.dtype),
        grid_spec=pltpu.PrefetchScalarGridSpec(
            num_scalar_prefetch=1,                  # conv weights -> SMEM, once
            grid=(N,),
            in_specs=[pl.BlockSpec((1, 1, H, W), lambda n, w: (n, 0, 0, 0)),
                      pl.BlockSpec((1, 1, H, W), lambda n, w: (n, 0, 0, 0))],
            out_specs=pl.BlockSpec((1, 1, H, W), lambda n, w: (n, 0, 0, 0)),
            scratch_shapes=[pltpu.VMEM((Hp, Wp), jnp.float32),
                            pltpu.VMEM((Hp, Wp), jnp.float32)],
        ),
        compiler_params=pltpu.CompilerParams(
            dimension_semantics=("parallel",),
        ),
    )(w_flat, avg_2d, max_2d)
    return out


if __name__ == "__main__":
    # Small shapes consistent with the module: batch=2, channels=4, spatial=16x16.
    N, C, H, W = 2, 4, 16, 16
    K = 7

    key = jax.random.PRNGKey(0)
    kx, kw, kx2 = jax.random.split(key, 3)
    x = jax.random.normal(kx, (N, C, H, W), dtype=jnp.float32)
    w = jax.random.normal(kw, (1, 2, K, K), dtype=jnp.float32) * 0.1  # Conv2d(2,1,7,bias=False)

    def ref_fn(xx, ww):
        avg = jnp.mean(xx, axis=1, keepdims=True)
        mx = jnp.max(xx, axis=1, keepdims=True)
        stacked = jnp.concatenate([avg, mx], axis=1)                  # (N, 2, H, W)
        return jax.nn.sigmoid(lax.conv_general_dilated(
            stacked, ww, window_strides=(1, 1),
            padding=((K // 2, K // 2), (K // 2, K // 2)),
            dimension_numbers=("NCHW", "OIHW", "NCHW")))

    # Default path: full-C tile, channel-reduction grid collapses to 1 step.
    out = spatial_attention(x, w, kernel_size=K)
    jax.block_until_ready(out)
    ref = ref_fn(x, w)
    assert out.shape == (N, 1, H, W)
    assert jnp.allclose(out, ref, atol=2e-5, rtol=1e-4), float(jnp.max(jnp.abs(out - ref)))

    # Also exercise the tiled + masked channel-reduction path (C % c_tile != 0).
    C2 = 20
    x2 = jax.random.normal(kx2, (N, C2, H, W), dtype=jnp.float32)
    out2 = spatial_attention(x2, w, kernel_size=K, c_tile=8)
    jax.block_until_ready(out2)
    ref2 = ref_fn(x2, w)
    assert jnp.allclose(out2, ref2, atol=2e-5, rtol=1e-4), float(jnp.max(jnp.abs(out2 - ref2)))

    print("KERNEL_OK")
</pallas_src>

<mosaic_0001>
module attributes {stable_mosaic.version = 11 : i64} {
  func.func @kernel(%arg0: i32, %arg1: i32, %arg2: memref<1x4x256xf32, #tpu.memory_space<vmem>>, %arg3: memref<1x1x256xf32, #tpu.memory_space<vmem>>, %arg4: memref<1x1x256xf32, #tpu.memory_space<vmem>>) attributes {dimension_semantics = [#tpu.dimension_semantics<parallel>, #tpu.dimension_semantics<arbitrary>], iteration_bounds = array<i64: 2, 1>, scalar_prefetch = 0 : i64, scratch_operands = 0 : i64, tpu.core_type = #tpu.core_type<tc>, window_params = [{transform_indices = @transform_0, window_bounds = array<i64: 1, 4, 256>}, {transform_indices = @transform_1, window_bounds = array<i64: 1, 1, 256>}, {transform_indices = @transform_2, window_bounds = array<i64: 1, 1, 256>}]} {
    %c0_i32 = arith.constant 0 : i32
    %0 = arith.cmpi eq, %arg1, %c0_i32 : i32
    %1 = arith.extui %0 : i1 to i32
    %c0_i32_0 = arith.constant 0 : i32
    %2 = arith.cmpi ne, %1, %c0_i32_0 : i32
    scf.if %2 {
      %cst_18 = arith.constant 0.000000e+00 : f32
      %17 = vector.broadcast %cst_18 : f32 to vector<1x1x256xf32>
      %c0_19 = arith.constant 0 : index
      %c0_20 = arith.constant 0 : index
      %c0_21 = arith.constant 0 : index
      %18 = vector.load %arg3[%c0_19, %c0_20, %c0_21] : memref<1x1x256xf32, #tpu.memory_space<vmem>>, vector<1x1x256xf32>
      tpu.vector_store %arg3[%c0_19, %c0_20, %c0_21], %17 {strides = array<i32>} : memref<1x1x256xf32, #tpu.memory_space<vmem>>, vector<1x1x256xf32>,
      %cst_22 = arith.constant 0xFF800000 : f32
      %19 = vector.broadcast %cst_22 : f32 to vector<1x1x256xf32>
      %c0_23 = arith.constant 0 : index
      %c0_24 = arith.constant 0 : index
      %c0_25 = arith.constant 0 : index
      %20 = vector.load %arg4[%c0_23, %c0_24, %c0_25] : memref<1x1x256xf32, #tpu.memory_space<vmem>>, vector<1x1x256xf32>
      tpu.vector_store %arg4[%c0_23, %c0_24, %c0_25], %19 {strides = array<i32>} : memref<1x1x256xf32, #tpu.memory_space<vmem>>, vector<1x1x256xf32>,
    } else {
    }
    %c0 = arith.constant 0 : index
    %c0_1 = arith.constant 0 : index
    %c0_2 = arith.constant 0 : index
    %3 = vector.load %arg2[%c0, %c0_1, %c0_2] : memref<1x4x256xf32, #tpu.memory_space<vmem>>, vector<1x4x256xf32>
    %c0_3 = arith.constant 0 : index
    %c0_4 = arith.constant 0 : index
    %c0_5 = arith.constant 0 : index
    %4 = vector.load %arg3[%c0_3, %c0_4, %c0_5] : memref<1x1x256xf32, #tpu.memory_space<vmem>>, vector<1x1x256xf32>
    %cst = arith.constant dense<0.000000e+00> : vector<1x256xf32>
    %5 = vector.multi_reduction <add>, %3, %cst [1] : vector<1x4x256xf32> to vector<1x256xf32>
    %6 = vector.shape_cast %5 : vector<1x256xf32> to vector<1x1x256xf32>
    %7 = arith.addf %4, %6 : vector<1x1x256xf32>
    %c0_6 = arith.constant 0 : index
    %c0_7 = arith.constant 0 : index
    %c0_8 = arith.constant 0 : index
    %8 = vector.load %arg3[%c0_6, %c0_7, %c0_8] : memref<1x1x256xf32, #tpu.memory_space<vmem>>, vector<1x1x256xf32>
    tpu.vector_store %arg3[%c0_6, %c0_7, %c0_8], %7 {strides = array<i32>} : memref<1x1x256xf32, #tpu.memory_space<vmem>>, vector<1x1x256xf32>,
    %c0_9 = arith.constant 0 : index
    %c0_10 = arith.constant 0 : index
    %c0_11 = arith.constant 0 : index
    %9 = vector.load %arg4[%c0_9, %c0_10, %c0_11] : memref<1x1x256xf32, #tpu.memory_space<vmem>>, vector<1x1x256xf32>
    %cst_12 = arith.constant dense<0xFF800000> : vector<1x256xf32>
    %10 = vector.multi_reduction <maximumf>, %3, %cst_12 [1] : vector<1x4x256xf32> to vector<1x256xf32>
    %11 = vector.shape_cast %10 : vector<1x256xf32> to vector<1x1x256xf32>
    %12 = arith.maximumf %9, %11 : vector<1x1x256xf32>
    %c0_13 = arith.constant 0 : index
    %c0_14 = arith.constant 0 : index
    %c0_15 = arith.constant 0 : index
    %13 = vector.load %arg4[%c0_13, %c0_14, %c0_15] : memref<1x1x256xf32, #tpu.memory_space<vmem>>, vector<1x1x256xf32>
    tpu.vector_store %arg4[%c0_13, %c0_14, %c0_15], %12 {strides = array<i32>} : memref<1x1x256xf32, #tpu.memory_space<vmem>>, vector<1x1x256xf32>,
    %c0_i32_16 = arith.constant 0 : i32
    %14 = arith.cmpi eq, %arg1, %c0_i32_16 : i32
    %15 = arith.extui %14 : i1 to i32
    %c0_i32_17 = arith.constant 0 : i32
    %16 = arith.cmpi ne, %15, %c0_i32_17 : i32
    scf.if %16 {
      %c0_18 = arith.constant 0 : index
      %c0_19 = arith.constant 0 : index
      %c0_20 = arith.constant 0 : index
      %17 = vector.load %arg3[%c0_18, %c0_19, %c0_20] : memref<1x1x256xf32, #tpu.memory_space<vmem>>, vector<1x1x256xf32>
      %cst_21 = arith.constant 2.500000e-01 : f32
      %18 = vector.broadcast %cst_21 : f32 to vector<1x1x256xf32>
      %19 = arith.mulf %17, %18 : vector<1x1x256xf32>
      %c0_22 = arith.constant 0 : index
      %c0_23 = arith.constant 0 : index
      %c0_24 = arith.constant 0 : index
      %20 = vector.load %arg3[%c0_22, %c0_23, %c0_24] : memref<1x1x256xf32, #tpu.memory_space<vmem>>, vector<1x1x256xf32>
      tpu.vector_store %arg3[%c0_22, %c0_23, %c0_24], %19 {strides = array<i32>} : memref<1x1x256xf32, #tpu.memory_space<vmem>>, vector<1x1x256xf32>,
    } else {
    }
    return
  }
  func.func @transform_0(%arg0: i32, %arg1: i32) -> (i32, i32, i32) {
    %c0_i32 = arith.constant 0 : i32
    %c0_i32_0 = arith.constant 0 : i32
    return %arg0, %arg1, %c0_i32 : i32, i32, i32
  }
  func.func @transform_1(%arg0: i32, %arg1: i32) -> (i32, i32, i32) {
    %c0_i32 = arith.constant 0 : i32
    %c0_i32_0 = arith.constant 0 : i32
    %c0_i32_1 = arith.constant 0 : i32
    return %arg0, %c0_i32, %c0_i32_0 : i32, i32, i32
  }
  func.func @transform_2(%arg0: i32, %arg1: i32) -> (i32, i32, i32) {
    %c0_i32 = arith.constant 0 : i32
    %c0_i32_0 = arith.constant 0 : i32
    %c0_i32_1 = arith.constant 0 : i32
    return %arg0, %c0_i32, %c0_i32_0 : i32, i32, i32
  }
}

</mosaic_0001>

<bundles_post_ra>
// kernel: tpu_custom_call.1
= control target key start
LH: loop header
LB: loop body
LE: loop exit
PB: predicated region body
PF: predicated region fallthrough
CT: control target
= control target key end

     0   :  { %8 = vsyncpa [#allocation3], 0  ;;  %s872_s0 = inlined_call_operand.hbm [shape: f32[2,4,256], index: 0, kind: input, shape index: {}]   ;;  %s873_s1 = inlined_call_operand.hbm [shape: f32[2,1,256], index: 1, kind: output, shape index: {0}]   ;;  %s874_s2 = inlined_call_operand.hbm [shape: f32[2,1,256], index: 2, kind: output, shape index: {1}]  }
   0x1   :  { %10 = vsyncpa [#allocation3 + $0x1], 0 }
   0x2   :  { %11 = vsyncpa [#allocation4], 0 }
   0x3   :  { %13 = vsyncpa [#allocation4 + $0x1], 0 }
   0x4   :  { %14 = vsyncpa [#allocation7], 0 }
   0x5   :  { %16 = vsyncpa [#allocation7 + $0x1], 0  ;;  %s683_s9 = smov 0   ;;  %s685_s10 = smov 0  }
   0x6   :  { %s687_s11 = smov 0   ;;  %s689_s12 = smov 0  }
   0x7   :  { %s691_s13 = smov 0   ;;  %s693_s14 = smov 0  }
   0x8 LB: > { %s429_s15 = sadd.s32 4294967295, %s660_s14   ;;  %s430_s16 = sadd.s32 4294967294, %s660_s14   ;;  %s660_s14 = sphi %s693_s14, %s22_s14   ;;  %s656_s13 = sphi %s691_s13, %s888_s13   ;;  %s652_s12 = sphi %s689_s12, %s887_s12   ;;  %s648_s11 = sphi %s687_s11, %s886_s11   ;;  %s644_s10 = sphi %s685_s10, %s885_s10   ;;  %s640_s9 = sphi %s683_s9, %s884_s9  }
   0x9   : > { %s34_s17 = sadd.s32 1, %s656_s13  ;;  %s43_s18 = sadd.s32 1, %s648_s11 }
   0xa   : > { %p36_p0 = scmp.ge.s32.totalorder %s34_s17, 2  ;;  %p50_p1 = scmp.ne.s32.totalorder %s648_s11, %s644_s10 }
   0xb   : > { %p51_p2 = scmp.eq.s32.totalorder %s660_s14, 0  ;;  %p56_p3 = scmp.ne.s32.totalorder %s644_s10, %s640_s9 }
   0xc   : > { %s890_s17 = smov (%p36_p0, %s34_s17), 0  ;;  %p57_p5 = scmp.eq.s32.totalorder %s429_s15, 0 }
   0xd   : > { %p724_p4 = por %p51_p2, %p50_p1  ;;  %s38_s20 = ssub.s32 %s656_s13, %s890_s17 }
   0xe   : > { %p80_p6 = scmp.eq.s32.totalorder %s429_s15, 1  ;;  %p41_p7 = scmp.eq.s32.totalorder %s38_s20, 0 }
   0xf   : > { %p730_p8 = por %p57_p5, %p56_p3  ;;  %p86_p10 = scmp.eq.s32.totalorder %s430_s16, 1 }
  0x10   : > { %p734_p9 = por %p80_p6, %p50_p1  ;;  %p468_p13 = scmp.lt.s32.totalorder %s660_s14, 2 }
  0x11   : > { %s739_s23 = scalar_select %p41_p7, %s648_s11, %s43_s18  }
  0x12   : > { %p741_p11 = por %p86_p10, %p56_p3  ;;  %s132_s25 = sand.u32 1, %s648_s11  }
  0x13   : > { %s433_s26 = sshll.u32 %s132_s25, 3  ;;  %s448_s27 = sshll.u32 %s656_s13, 7 }
  0x14   : > { %s878_s24 = scalar_select %p741_p11, 1, 0 }
  0x15   : > { %s144_s30 = scalar_lea.hbm %s872_s0, %s448_s27  ;;  %s136_s3 = scalar_lea.vmem [#allocation2], %s433_s26 }
  0x16   : > { %s146_s4 = sshll.u32 %s136_s3, 4  ;;  %p754_p0 = pnand %p468_p13, %p724_p4  ;;  %s147_s4 = int_to_ptr.vmem [resolvable:$true] %s146_s4 }
  0x17   : > { %p436_p1 = scmp.ge.s32.totalorder %s660_s14, 1  ;;  %p151_p2 = scmp.lt.s32.totalorder %s660_s14, 3 }
  0x18   : > { %s133_s6 = scalar_lea.sflag [#allocation3], %s132_s25  ;;  %p524_p3 = pneg %p754_p0 }
  0x19   : > { %s535_s7 = scalar_lea.vmem %s147_s4, 128  ;;  %s662_s8 = smov [#allocation2]  }
  0x1a   : > { %p536_p5 = scmp.ne.s32.totalorder %s147_s4, %s535_s7  ;;  %s540_s15 = sshll.u32 %s662_s8, 4  ;;  %s541_s15 = int_to_ptr.vmem [resolvable:$false] %s540_s15 }
  0x1b   : > { %s542_s16 = scalar_lea.vmem %s541_s15, 256  ;;  %p543_p10 = scmp.lt.s32.totalorder %s147_s4, %s541_s15 }
  0x1c   : > { %p538_p6 = pnand %p536_p5, %p524_p3  ;;  %p544_p12 = scmp.lt.s32.totalorder %s542_s16, %s535_s7 }
  0x1e   : > { %p539_p7 = pneg %p538_p6  ;;  %p545_p4 = por %p544_p12, %p543_p10 }
  0x20   : > { %p546_p13 = pnand %p545_p4, %p539_p7 }
  0x22   : > { %549 = shalt.err (!%p546_p13)
}
  0x23   : > { %460 = dma.hbm_to_vmem [thread:$0]  (!%p754_p0), %s144_s30, 128, %s147_s4, %s133_s6  }
  0x24   : > { %p152_p11 = pnand %p436_p1, %p151_p2 }
  0x25   : > { %s769_s18 = sand.u32 (!%p152_p11), 1, %s644_s10  }
  0x26   : > { %155 = sbr.rel (%p152_p11) target bundleno = 104 (0x68), region = 24  ;;  %s437_s19 = sshll.u32 (!%p152_p11), %s769_s18, 3 }
  0x27   : > { %s158_s20 = scalar_lea.sflag (!%p152_p11), [#allocation3], %s769_s18  ;;  %s161_s25 = scalar_lea.vmem (!%p152_p11), [#allocation2], %s437_s19 }
  0x2b   : > { %627 = dma.done.wait (%p730_p8), %s158_s20, 128  }
  0x2c   : > { %629 = vsyncadd (%p730_p8), %s158_s20, 4294967168  ;;  %s438_s26 = sshll.u32 %s769_s18, 1  ;;  %v191_v0 = vlaneseq  ;;  %v663_v2 = vmov 0.0   ;;  %v664_v3 = vmov -inf   ;;  %vm202_vm1 = vcmask 1043456   ;;  %v197_v4 = vld [vmem:[%s161_s25] sm:$0xff] }
  0x2d   : > { %s782_s27 = scalar_lea.vmem [#allocation5], %s438_s26  ;;  %s787_s28 = scalar_lea.vmem [#allocation6], %s438_s26  ;;  %v200_v5 = vcombine.high %v197_v4, %v197_v4  ;;  %v242_v6 = vsel %vm202_vm1, %v197_v4, -inf  ;;  %v203_v7 = vsel %vm202_vm1, %v197_v4, 0.0  ;;  %v665_v16 = vmov 1966171168  }
  0x2e   : > { %vm778_vm0 = vcmp.lt.s32.totalorder %v191_v0, 256  ;;  %v243_v8 = vrot.slane %v242_v6, 4  ;;  %v204_v9 = vrot.slane %v203_v7, 4  ;;  %v221_v17 = vunpack.c.l.s4 %v665_v16  ;;  %s449_s21 = sshll.u32 %s652_s12, 5  ;;  %s316_s29 = sshll.u32 %s787_s28, 4  ;;  %s317_s29 = int_to_ptr.vmem [resolvable:$true] %s316_s29 }
  0x2f   : > { %195 = vst.msk [vmem:[%s782_s27] sm:$0x3] %vm778_vm0, %v663_v2  ;;  %196 = vst.msk [vmem:[%s787_s28] sm:$0x3] %vm778_vm0, %v664_v3  ;;  %v249_v10 = vsel %vm202_vm1, %v200_v5, -inf  ;;  %v210_v11 = vsel %vm202_vm1, %v200_v5, 0.0  ;;  %s801_s4 = scalar_lea.hbm %s874_s2, %s449_s21 }
  0x30   : > { %v244_v12 = vmax.f32 %v242_v6, %v243_v8  ;;  %v250_v13 = vrot.slane %v249_v10, 4  ;;  %v205_v14 = vadd.f32 %v204_v9, %v203_v7  ;;  %v211_v15 = vrot.slane %v210_v11, 4  ;;  %s288_s5 = scalar_lea.sflag [#allocation7], %s769_s18  ;;  %s550_s6 = scalar_lea.vmem %s317_s29, 32 }
  0x31   : > { %v222_v26 = vunpack.c.0.s8 %v221_v17  ;;  %v224_v27 = vshrl.u32 %v191_v0, 7  ;;  %p551_p8 = scmp.ne.s32.totalorder %s317_s29, %s550_s6  ;;  %s666_s7 = smov [#allocation6]  }
  0x32   : > { %v245_v18 = vrot.slane %v244_v12, 2  ;;  %v251_v19 = vmax.f32 %v249_v10, %v250_v13  ;;  %v206_v20 = vrot.slane %v205_v14, 2  ;;  %v212_v21 = vadd.f32 %v211_v15, %v210_v11  ;;  %s554_s8 = sshll.u32 %s666_s7, 4  ;;  %s555_s8 = int_to_ptr.vmem [resolvable:$false] %s554_s8 }
  0x33   : > { %v225_v36 = vsub.s32 %v222_v26, %v224_v27  ;;  %p552_p11 = pnand %p551_p8, %p734_p9  ;;  %s556_s15 = scalar_lea.vmem %s555_s8, 64 }
  0x34   : > { %v246_v22 = vmax.f32 %v244_v12, %v245_v18  ;;  %v252_v23 = vrot.slane %v251_v19, 2  ;;  %v207_v24 = vadd.f32 %v206_v20, %v205_v14  ;;  %v213_v25 = vrot.slane %v212_v21, 2  ;;  %p557_p0 = scmp.lt.s32.totalorder %s317_s29, %s555_s8  ;;  %p558_p1 = scmp.lt.s32.totalorder %s556_s15, %s550_s6 }
  0x35   : > { %p553_p12 = pneg %p552_p11 }
  0x36   : > { %v247_v28 = vrot.slane %v246_v22, 1  ;;  %v253_v29 = vmax.f32 %v251_v19, %v252_v23  ;;  %v208_v30 = vrot.slane %v207_v24, 1  ;;  %v214_v31 = vadd.f32 %v213_v25, %v212_v21  ;;  %v241_v43 = vld [vmem:[%s787_s28] sm:$0x3]  ;;  %v198_v44 = vld [vmem:[%s782_s27] sm:$0x3]  ;;  %p559_p2 = por %p558_p1, %p557_p0 }
  0x38   : > { %v248_v32 = vmax.f32 %v246_v22, %v247_v28  ;;  %v254_v33 = vrot.slane %v253_v29, 1  ;;  %v209_v34 = vadd.f32 %v208_v30, %v207_v24  ;;  %v215_v35 = vrot.slane %v214_v31, 1  ;;  %p560_p3 = pnand %p559_p2, %p553_p12 }
  0x3a   : > { %v255_v37 = vmax.f32 %v253_v29, %v254_v33  ;;  %v216_v38 = vadd.f32 %v215_v35, %v214_v31 }
  0x3c   : > { %v258_v39 = vcombine.low %v248_v32, %v255_v37  ;;  %v219_v40 = vcombine.low %v209_v34, %v216_v38 }
  0x3e   : > { %v265_v41 = vrot.slane %v258_v39, %v225_v36  ;;  %v226_v42 = vrot.slane %v219_v40, %v225_v36 }
  0x40   : > { %v272_v45 = vrot.slane %v265_v41, %v225_v36  ;;  %v233_v46 = vrot.slane %v226_v42, %v225_v36 }
  0x42   : > { %v274_v47 = vmax.f32 %v241_v43, %v272_v45  ;;  %v235_v48 = vadd.f32 %v233_v46, %v198_v44 }
  0x44   : > { %275 = vst.msk [vmem:[%s787_s28] sm:$0x3] %vm778_vm0, %v274_v47  ;;  %240 = vst.msk [vmem:[%s782_s27] sm:$0x3] %vm778_vm0, %v235_v48 }
  0x45   : > { %563 = shalt.err (!%p560_p3)
}
  0x46   : > { %s564_s16 = scalar_lea.hbm %s801_s4, 32  ;;  %s568_s25 = scalar_lea.hbm %s874_s2, 64 }
  0x47   : > { %p565_p5 = scmp.ne.s32.totalorder %s801_s4, %s564_s16  ;;  %p569_p10 = scmp.lt.s32.totalorder %s801_s4, %s874_s2 }
  0x48   : > { %p570_p4 = scmp.lt.s32.totalorder %s568_s25, %s564_s16 }
  0x49   : > { %p566_p6 = pnand %p565_p5, %p734_p9 }
  0x4a   : > { %p571_p13 = por %p570_p4, %p569_p10 }
  0x4b   : > { %p567_p7 = pneg %p566_p6 }
  0x4d   : > { %p572_p8 = pnand %p571_p13, %p567_p7 }
  0x4f   : > { %575 = shalt.err (!%p572_p8)
}
  0x50   : > { %454 = dma.vmem_to_hbm [thread:$0]  (%p734_p9), %s317_s29, 32, %s801_s4, %s288_s5   ;;  %v279_v49 = vld [vmem:[%s782_s27] sm:$0x3] }
  0x51   : > { %s302_s30 = sshll.u32 %s782_s27, 4  ;;  %v280_v50 = vmul.f32 0.25, %v279_v49  ;;  %s300_s7 = scalar_lea.hbm %s873_s1, %s449_s21  ;;  %s303_s30 = int_to_ptr.vmem [resolvable:$true] %s302_s30 }
  0x52   : > { %s283_s8 = scalar_lea.sflag [#allocation4], %s769_s18  ;;  %s576_s15 = scalar_lea.vmem %s303_s30, 32 }
  0x53   : > { %281 = vst.msk [vmem:[%s782_s27] sm:$0x3] %vm778_vm0, %v280_v50  ;;  %p577_p11 = scmp.ne.s32.totalorder %s303_s30, %s576_s15  ;;  %s667_s16 = smov [#allocation5]  }
  0x54   : > { %s580_s29 = sshll.u32 %s667_s16, 4  ;;  %s581_s29 = int_to_ptr.vmem [resolvable:$false] %s580_s29 }
  0x55   : > { %p578_p12 = pnand %p577_p11, %p734_p9  ;;  %s582_s4 = scalar_lea.vmem %s581_s29, 64 }
  0x56   : > { %p583_p1 = scmp.lt.s32.totalorder %s303_s30, %s581_s29  ;;  %p584_p2 = scmp.lt.s32.totalorder %s582_s4, %s576_s15 }
  0x57   : > { %p579_p0 = pneg %p578_p12 }
  0x58   : > { %p585_p3 = por %p584_p2, %p583_p1 }
  0x5a   : > { %p586_p5 = pnand %p585_p3, %p579_p0 }
  0x5c   : > { %589 = shalt.err (!%p586_p5)
}
  0x5d   : > { %s590_s12 = scalar_lea.hbm %s300_s7, 32  ;;  %s594_s21 = scalar_lea.hbm %s873_s1, 64 }
  0x5e   : > { %p591_p6 = scmp.ne.s32.totalorder %s300_s7, %s590_s12  ;;  %p595_p4 = scmp.lt.s32.totalorder %s300_s7, %s873_s1 }
  0x5f   : > { %p596_p13 = scmp.lt.s32.totalorder %s594_s21, %s590_s12 }
  0x60   : > { %p592_p7 = pnand %p591_p6, %p734_p9 }
  0x61   : > { %p597_p8 = por %p596_p13, %p595_p4 }
  0x62   : > { %p593_p10 = pneg %p592_p7 }
  0x64   : > { %p598_p11 = pnand %p597_p8, %p593_p10 }
  0x66   : > { %601 = shalt.err (!%p598_p11)
}
  0x67   : > { %453 = dma.vmem_to_hbm [thread:$0]  (%p734_p9), %s303_s30, 32, %s300_s7, %s283_s8  }
  0x68 PF: > { %s328_s20 = sand.u32 1, %s640_s9   ;;  %p882_p12 = scmp.ne.s32.totalorder %s878_s24, 0 }
  0x69   : > { %p883_p0 = scmp.ge.s32.totalorder %s660_s14, 2  ;;  %s329_s25 = scalar_lea.sflag [#allocation4], %s328_s20 }
  0x6b   : > { %p462_p1 = pnand %p883_p0, %p882_p12 }
  0x6d   : > { %p463_p2 = pneg %p462_p1 }
  0x6f   : > { %631 = dma.done.wait (%p463_p2), %s329_s25, 32  }
  0x70   : > { %633 = vsyncadd (%p463_p2), %s329_s25, 4294967264  ;;  %s338_s26 = scalar_lea.sflag [#allocation7], %s328_s20 }
  0x71   : > { %635 = dma.done.wait (%p463_p2), %s338_s26, 32  }
  0x72   : > { %637 = vsyncadd (%p463_p2), %s338_s26, 4294967264  ;;  %s22_s14 = sadd.s32 1, %s660_s14   ;;  %s884_s9 = smov %s644_s10 }
  0x73   : > { %p19_p3 = scmp.ge.s32.totalorder %s22_s14, 4   ;;  %s885_s10 = smov %s648_s11 }
  0x74   : > { %s886_s11 = smov %s739_s23  ;;  %s887_s12 = smov %s656_s13 }
  0x75   : > { %s888_s13 = smov %s890_s17  ;;  %21 = sbr.rel (!%p19_p3) target bundleno = 8 (0x8), region = 94 }
  0x7a   :  { %343 = vsyncpa [#allocation3], 1 }
  0x7b   :  { %345 = vsyncpa [#allocation3 + $0x1], 1 }
  0x7c   :  { %346 = vsyncpa [#allocation4], 1 }
  0x7d   :  { %348 = vsyncpa [#allocation4 + $0x1], 1 }
  0x7e   :  { %349 = vsyncpa [#allocation7], 1 }
  0x7f   :  { %351 = vsyncpa [#allocation7 + $0x1], 1 }

</bundles_post_ra>
